<compile_context>
chip_gen: v7x
topology: tpu7x:2x2x1
jax: 0.10.0
libtpu: 0.0.40
codegen_flags: <defaults>
</compile_context>

<pallas_src>
import functools
import math

import jax
import jax.numpy as jnp
from jax.experimental import pallas as pl
from jax.experimental.pallas import tpu as pltpu


# ---------------------------------------------------------------------------
# helpers
# ---------------------------------------------------------------------------
def _round_up(x, m):
    return ((x + m - 1) // m) * m


class KeyGen:
    def __init__(self, key):
        self.key = key

    def __call__(self):
        self.key, sub = jax.random.split(self.key)
        return sub


def xavier(key, shape):
    fan_in = int(math.prod(shape[:-1]))
    fan_out = int(shape[-1])
    std = (2.0 / (fan_in + fan_out)) ** 0.5
    return (std * jax.random.normal(key, shape)).astype(jnp.float32)


# ---------------------------------------------------------------------------
# Pallas kernel: tiled matmul + bias + activation (K-tiled, bf16 MXU, f32 acc)
# ---------------------------------------------------------------------------
def _mm_kernel(a_ref, w_ref, b_ref, o_ref, acc_ref, *, act):
    k = pl.program_id(2)

    @pl.when(k == 0)
    def _():
        acc_ref[...] = jnp.zeros_like(acc_ref)

    acc_ref[...] += jnp.dot(a_ref[...].astype(jnp.bfloat16),
                            w_ref[...].astype(jnp.bfloat16),
                            preferred_element_type=jnp.float32)

    @pl.when(k == pl.num_programs(2) - 1)
    def _():
        y = acc_ref[...] + b_ref[...]
        if act == "relu":
            y = jnp.maximum(y, 0.0)
        elif act == "gelu":
            y = jax.nn.gelu(y, approximate=True)
        elif act == "sigmoid":
            y = jax.nn.sigmoid(y)
        o_ref[...] = y.astype(o_ref.dtype)


def matmul_bias_act(A, W, b, act=None):
    """y = act(A @ W + b); bf16 MXU operands, f32 accumulation, K-tiled."""
    M, K = A.shape
    Kw, N = W.shape
    assert K == Kw
    tm = 256 if M >= 256 else _round_up(M, 8)
    Mp = _round_up(M, tm)
    tn = 128
    Np = _round_up(N, tn)
    Kp = _round_up(K, 128)
    if Kp % 512 == 0:
        tk = 512
    elif Kp % 256 == 0:
        tk = 256
    else:
        tk = 128
    nk = Kp // tk

    Ap = jnp.pad(A, ((0, Mp - M), (0, Kp - K)))
    Wpad = jnp.pad(W, ((0, Kp - K), (0, Np - N)))
    bp = jnp.pad(b, (0, Np - N)).reshape(1, Np)

    out = pl.pallas_call(
        functools.partial(_mm_kernel, act=act),
        out_shape=jax.ShapeDtypeStruct((Mp, Np), jnp.float32),
        grid=(Mp // tm, Np // tn, nk),
        in_specs=[
            pl.BlockSpec((tm, tk), lambda i, j, k: (i, k)),
            pl.BlockSpec((tk, tn), lambda i, j, k: (k, j)),
            pl.BlockSpec((1, tn), lambda i, j, k: (0, j)),
        ],
        out_specs=pl.BlockSpec((tm, tn), lambda i, j, k: (i, j)),
        scratch_shapes=[pltpu.VMEM((tm, tn), jnp.float32)],
        compiler_params=pltpu.CompilerParams(
            dimension_semantics=("parallel", "parallel", "arbitrary")),
    )(Ap, Wpad, bp)
    return out[:M, :N]


# ---------------------------------------------------------------------------
# Pallas kernel: row-tiled layernorm
# ---------------------------------------------------------------------------
def _ln_kernel(x_ref, g_ref, b_ref, o_ref):
    x = x_ref[...]
    mu = jnp.mean(x, axis=-1, keepdims=True)
    var = jnp.mean((x - mu) ** 2, axis=-1, keepdims=True)
    y = (x - mu) * jax.lax.rsqrt(var + 1e-5)
    o_ref[...] = (y * g_ref[...] + b_ref[...]).astype(o_ref.dtype)


def layernorm(x, gamma, beta):
    R, C = x.shape
    tr = min(256, _round_up(R, 8))
    Rp = _round_up(R, tr)
    xp = jnp.pad(x, ((0, Rp - R), (0, 0)))
    out = pl.pallas_call(
        _ln_kernel,
        out_shape=jax.ShapeDtypeStruct((Rp, C), jnp.float32),
        grid=(Rp // tr,),
        in_specs=[
            pl.BlockSpec((tr, C), lambda i: (i, 0)),
            pl.BlockSpec((1, C), lambda i: (0, 0)),
            pl.BlockSpec((1, C), lambda i: (0, 0)),
        ],
        out_specs=pl.BlockSpec((tr, C), lambda i: (i, 0)),
        compiler_params=pltpu.CompilerParams(dimension_semantics=("parallel",)),
    )(xp, gamma.reshape(1, C), beta.reshape(1, C))
    return out[:R]


# ---------------------------------------------------------------------------
# Pallas kernel: batched window attention (many windows + all heads per step)
# qkv layout: (BW, N, 3*heads, d)  ->  output (BW, N, heads, d)
# ---------------------------------------------------------------------------
def _attn_kernel(qkv_ref, bias_ref, o_ref, *, heads, scale):
    for h in range(heads):
        q = qkv_ref[:, :, h, :].astype(jnp.bfloat16)
        k = qkv_ref[:, :, heads + h, :].astype(jnp.bfloat16)
        v = qkv_ref[:, :, 2 * heads + h, :].astype(jnp.bfloat16)
        s = jnp.einsum("gnd,gmd->gnm", q, k,
                       preferred_element_type=jnp.float32) * scale
        s = s + bias_ref[h][None]
        s = s - jnp.max(s, axis=-1, keepdims=True)
        p = jnp.exp(s)
        p = p * pl.reciprocal(jnp.sum(p, axis=-1, keepdims=True), approx=True)
        o = jnp.einsum("gnm,gmd->gnd", p.astype(jnp.bfloat16), v,
                       preferred_element_type=jnp.float32)
        o_ref[:, :, h, :] = o.astype(o_ref.dtype)


def window_attention(qkv4, rel_bias, heads, scale):
    """qkv4: (BW, N, 3*heads, d); rel_bias: (heads, N, N)."""
    BW, N, _, d = qkv4.shape
    G = 1
    for g in range(min(BW, 16), 0, -1):
        if BW % g == 0:
            G = g
            break
    return pl.pallas_call(
        functools.partial(_attn_kernel, heads=heads, scale=scale),
        out_shape=jax.ShapeDtypeStruct((BW, N, heads, d), jnp.float32),
        grid=(BW // G,),
        in_specs=[
            pl.BlockSpec((G, N, 3 * heads, d), lambda g: (g, 0, 0, 0)),
            pl.BlockSpec((heads, N, N), lambda g: (0, 0, 0)),
        ],
        out_specs=pl.BlockSpec((G, N, heads, d), lambda g: (g, 0, 0, 0)),
        compiler_params=pltpu.CompilerParams(dimension_semantics=("parallel",)),
    )(qkv4, rel_bias)


# ---------------------------------------------------------------------------
# Pallas kernel: fused 3x3 conv (stride 1, pad 1) + bias + activation
# Input is the zero-padded image flattened over (Hp*Wp) so every tap is a
# constant flat row offset.  Each grid step DMAs one halo'd spatial slab into
# a double-buffered VMEM scratch (prefetching the next slab before waiting on
# the current one) and accumulates 9 shifted bf16 matmuls in f32 -- no im2col
# materialization in HBM and no per-tap grid steps.
# ---------------------------------------------------------------------------
def _conv_kernel(x_hbm, w_ref, b_ref, o_ref, xbuf, sem, *, tq, Wp, slab, act):
    bb = pl.program_id(0)
    qq = pl.program_id(1)
    nq = pl.num_programs(1)
    nsteps = pl.num_programs(0) * nq
    l = bb * nq + qq
    slot = l % 2

    # Prime the pipeline: first step starts its own DMA into slot 0.
    @pl.when(l == 0)
    def _():
        pltpu.make_async_copy(x_hbm.at[bb, pl.ds(qq * tq, slab)],
                              xbuf.at[0], sem.at[0]).start()

    # Prefetch the next block's halo'd slab into the other slot.
    nxt = l + 1

    @pl.when(nxt < nsteps)
    def _():
        nbb = nxt // nq
        nqq = nxt % nq
        pltpu.make_async_copy(x_hbm.at[nbb, pl.ds(nqq * tq, slab)],
                              xbuf.at[1 - slot], sem.at[1 - slot]).start()

    # Wait for the current slab.
    pltpu.make_async_copy(x_hbm.at[bb, pl.ds(qq * tq, slab)],
                          xbuf.at[slot], sem.at[slot]).wait()

    cur = xbuf.at[slot]                              # (slab, C) VMEM view
    acc = jnp.zeros((tq, o_ref.shape[-1]), jnp.float32)
    for t in range(9):                               # 9 taps, fully unrolled
        off = (t // 3) * Wp + (t % 3)                # static flat row offset
        patch = cur[pl.ds(off, tq), :]
        acc = acc + jnp.dot(patch.astype(jnp.bfloat16),
                            w_ref[t].astype(jnp.bfloat16),
                            preferred_element_type=jnp.float32)

    y = acc + b_ref[...]
    if act == "relu":
        y = jnp.maximum(y, 0.0)
    elif act == "sigmoid":
        y = jax.nn.sigmoid(y)
    o_ref[...] = y[None].astype(o_ref.dtype)


def conv3x3(x, w, b, act):
    """x: (B,H,W,C); w: (9, C, Cout); b: (Cout,)."""
    B, H, W, C = x.shape
    Cout = w.shape[-1]
    Cp = _round_up(Cout, 8)
    wpad = jnp.pad(w, ((0, 0), (0, 0), (0, Cp - Cout)))
    bpad = jnp.pad(b, (0, Cp - Cout)).reshape(1, Cp)

    Hp, Wp = H + 2, W + 2
    L = Hp * Wp
    tq = min(512, _round_up(L, 8))
    Q = _round_up(L, tq)
    halo = 2 * Wp + 2
    slab = tq + halo
    xflat = jnp.pad(x, ((0, 0), (1, 1), (1, 1), (0, 0))).reshape(B, L, C)
    xflat = jnp.pad(xflat, ((0, 0), (0, Q + halo - L), (0, 0)))

    out = pl.pallas_call(
        functools.partial(_conv_kernel, tq=tq, Wp=Wp, slab=slab, act=act),
        out_shape=jax.ShapeDtypeStruct((B, Q, Cp), jnp.float32),
        grid=(B, Q // tq),
        in_specs=[
            pl.BlockSpec(memory_space=pl.ANY),                  # raw HBM, manual DMA
            pl.BlockSpec((9, C, Cp), lambda b_, q_: (0, 0, 0)),  # all taps resident
            pl.BlockSpec((1, Cp), lambda b_, q_: (0, 0)),
        ],
        out_specs=pl.BlockSpec((1, tq, Cp), lambda b_, q_: (b_, q_, 0)),
        scratch_shapes=[
            pltpu.VMEM((2, slab, C), jnp.float32),               # double-buffered slab
            pltpu.SemaphoreType.DMA((2,)),
        ],
        compiler_params=pltpu.CompilerParams(
            dimension_semantics=("arbitrary", "arbitrary")),
    )(xflat, wpad, bpad)

    out = out[:, :L, :Cout].reshape(B, Hp, Wp, Cout)[:, :H, :W, :]
    return out


# ---------------------------------------------------------------------------
# model glue (reshapes / padding; compute goes through Pallas kernels)
# ---------------------------------------------------------------------------
DIMS = [96, 192, 384, 768]
HEADS = [3, 6, 12, 24]


def window_partition(x, ws):
    B, H, W, C = x.shape
    x = x.reshape(B, H // ws, ws, W // ws, ws, C)
    x = jnp.transpose(x, (0, 1, 3, 2, 4, 5))
    return x.reshape(-1, ws * ws, C)


def window_reverse(wins, ws, B, H, W):
    C = wins.shape[-1]
    x = wins.reshape(B, H // ws, W // ws, ws, ws, C)
    x = jnp.transpose(x, (0, 1, 3, 2, 4, 5))
    return x.reshape(B, H, W, C)


def patch_embed(x, p):
    # 4x4 stride-4 conv (6 -> 96) as non-overlapping patch matmul.
    B, H, W, C = x.shape
    x = x.reshape(B, H // 4, 4, W // 4, 4, C)
    x = jnp.transpose(x, (0, 1, 3, 2, 4, 5)).reshape(B * (H // 4) * (W // 4), 4 * 4 * C)
    y = matmul_bias_act(x, p["w"], p["b"], None)
    y = layernorm(y, p["ln_g"], p["ln_b"])
    return y.reshape(B, H // 4, W // 4, 96)


def swin_block(x, p, heads, ws):
    B, H, W, C = x.shape
    d = C // heads
    shortcut = x

    xn = layernorm(x.reshape(B * H * W, C), p["ln1_g"], p["ln1_b"]).reshape(B, H, W, C)
    wins = window_partition(xn, ws)                         # (BW, N, C)
    BW, N, _ = wins.shape
    qkv = matmul_bias_act(wins.reshape(BW * N, C), p["qkv_w"], p["qkv_b"], None)
    if N > 1:
        qkv4 = qkv.reshape(BW, N, 3 * heads, d)             # packed [q|k|v][head][d]
        attn = window_attention(qkv4, p["rel_bias"], heads, scale=d ** -0.5)
        attn = attn.reshape(BW * N, C)
    else:
        attn = qkv[:, 2 * C:]                               # softmax over 1 token == identity
    proj = matmul_bias_act(attn, p["proj_w"], p["proj_b"], None).reshape(BW, N, C)
    x = shortcut + window_reverse(proj, ws, B, H, W)

    xn = layernorm(x.reshape(B * H * W, C), p["ln2_g"], p["ln2_b"])
    h = matmul_bias_act(xn, p["fc1_w"], p["fc1_b"], "gelu")
    h = matmul_bias_act(h, p["fc2_w"], p["fc2_b"], None)
    return x + h.reshape(B, H, W, C)


def patch_merging(x, p):
    B, H, W, C = x.shape
    x0 = x[:, 0::2, 0::2, :]
    x1 = x[:, 1::2, 0::2, :]
    x2 = x[:, 0::2, 1::2, :]
    x3 = x[:, 1::2, 1::2, :]
    x = jnp.concatenate([x0, x1, x2, x3], axis=-1).reshape(-1, 4 * C)
    x = layernorm(x, p["ln_g"], p["ln_b"])
    y = matmul_bias_act(x, p["red_w"], jnp.zeros((2 * C,), jnp.float32), None)
    return y.reshape(B, H // 2, W // 2, 2 * C)


def upsample2(x):
    # TODO(synk): not yet fused into the following conv kernel.
    return jnp.repeat(jnp.repeat(x, 2, axis=1), 2, axis=2)


# ---------------------------------------------------------------------------
# parameters
# ---------------------------------------------------------------------------
def init_params(key, img_hw):
    kg = KeyGen(key)
    H, W = img_hw
    p = {}
    p["patch_embed"] = {
        "w": xavier(kg(), (6 * 4 * 4, 96)),
        "b": jnp.zeros((96,), jnp.float32),
        "ln_g": jnp.ones((96,), jnp.float32),
        "ln_b": jnp.zeros((96,), jnp.float32),
    }
    stages, merges = [], []
    r = H // 4
    for i, C in enumerate(DIMS):
        ws = min(r, 4)
        N = ws * ws
        h = HEADS[i]
        stages.append({
            "ln1_g": jnp.ones((C,), jnp.float32), "ln1_b": jnp.zeros((C,), jnp.float32),
            "qkv_w": xavier(kg(), (C, 3 * C)), "qkv_b": jnp.zeros((3 * C,), jnp.float32),
            "rel_bias": (0.02 * jax.random.normal(kg(), (h, N, N))).astype(jnp.float32),
            "proj_w": xavier(kg(), (C, C)), "proj_b": jnp.zeros((C,), jnp.float32),
            "ln2_g": jnp.ones((C,), jnp.float32), "ln2_b": jnp.zeros((C,), jnp.float32),
            "fc1_w": xavier(kg(), (C, 4 * C)), "fc1_b": jnp.zeros((4 * C,), jnp.float32),
            "fc2_w": xavier(kg(), (4 * C, C)), "fc2_b": jnp.zeros((C,), jnp.float32),
        })
        if i < 3:
            merges.append({
                "ln_g": jnp.ones((4 * C,), jnp.float32),
                "ln_b": jnp.zeros((4 * C,), jnp.float32),
                "red_w": xavier(kg(), (4 * C, 2 * C)),
            })
            r //= 2
    p["stages"] = stages
    p["merges"] = merges

    dec = {}
    for name, cin, cout in [("c1", 768, 384), ("c2", 384, 192), ("c3", 192, 96),
                            ("c4", 96, 48), ("c5", 48, 32), ("c6", 35, 16), ("c7", 16, 1)]:
        dec[name + "_w"] = xavier(kg(), (9, cin, cout))      # 3x3 taps (di,dj) x Cin x Cout
        dec[name + "_b"] = jnp.zeros((cout,), jnp.float32)
    p["decoder"] = dec
    return p


# ---------------------------------------------------------------------------
# forward
# ---------------------------------------------------------------------------
def generator_matteformer_forward(params, image, trimap, alpha):
    # image/trimap: NCHW (B,3,H,W); alpha: (B,1,H,W). Internal layout: NHWC.
    img = jnp.transpose(image, (0, 2, 3, 1))
    tri = jnp.transpose(trimap, (0, 2, 3, 1))
    inp = jnp.concatenate([img, tri], axis=-1)        # == torch.cat(axis=1) in NCHW

    # ----- encoder (Swin-style FastNet stand-in) -----
    x = patch_embed(inp, params["patch_embed"])       # (B, H/4, W/4, 96)
    feats = []
    for i in range(4):
        ws = min(x.shape[1], 4)
        x = swin_block(x, params["stages"][i], HEADS[i], ws)
        feats.append(x)
        if i < 3:
            x = patch_merging(x, params["merges"][i])
    embedding = feats[-1]                             # (B, H/32, W/32, 768)
    skips = feats[:-1]

    # ----- decoder (res-shortcut style) -----
    dec = params["decoder"]
    d = upsample2(embedding)
    d = conv3x3(d, dec["c1_w"], dec["c1_b"], "relu") + skips[2]
    d = upsample2(d)
    d = conv3x3(d, dec["c2_w"], dec["c2_b"], "relu") + skips[1]
    d = upsample2(d)
    d = conv3x3(d, dec["c3_w"], dec["c3_b"], "relu") + skips[0]
    d = upsample2(d)
    d = conv3x3(d, dec["c4_w"], dec["c4_b"], "relu")
    d = upsample2(d)
    d = conv3x3(d, dec["c5_w"], dec["c5_b"], "relu")
    d = jnp.concatenate([d, img], axis=-1)            # image shortcut at full res
    d = conv3x3(d, dec["c6_w"], dec["c6_b"], "relu")
    a = conv3x3(d, dec["c7_w"], dec["c7_b"], "sigmoid")
    return jnp.transpose(a, (0, 3, 1, 2))             # NCHW (B,1,H,W)


# ---------------------------------------------------------------------------
if __name__ == "__main__":
    B, H, W = 2, 32, 32
    key = jax.random.PRNGKey(0)
    k1, k2, k3 = jax.random.split(key, 3)
    image = jax.random.normal(k1, (B, 3, H, W), dtype=jnp.float32)
    trimap = jax.random.normal(k2, (B, 3, H, W), dtype=jnp.float32)
    alpha = jax.random.uniform(k3, (B, 1, H, W), dtype=jnp.float32)

    params = init_params(jax.random.PRNGKey(42), (H, W))
    out = generator_matteformer_forward(params, image, trimap, alpha)
    out = jax.block_until_ready(out)
    assert out.shape == (B, 1, H, W), out.shape
    assert bool(jnp.all(jnp.isfinite(out)))
    print("KERNEL_OK")
</pallas_src>

<mosaic_0001>
module attributes {stable_mosaic.version = 11 : i64} {
  func.func @_mm_kernel(%arg0: i32, %arg1: i32, %arg2: i32, %arg3: memref<128x128xf32, #tpu.memory_space<vmem>>, %arg4: memref<128x128xf32, #tpu.memory_space<vmem>>, %arg5: memref<1x128xf32, #tpu.memory_space<vmem>>, %arg6: memref<128x128xf32, #tpu.memory_space<vmem>>, %arg7: memref<128x128xf32, #tpu.memory_space<vmem>>) attributes {dimension_semantics = [#tpu.dimension_semantics<parallel>, #tpu.dimension_semantics<parallel>, #tpu.dimension_semantics<arbitrary>], iteration_bounds = array<i64: 1, 1, 1>, scalar_prefetch = 0 : i64, scratch_operands = 1 : i64, tpu.core_type = #tpu.core_type<tc>, window_params = [{transform_indices = @transform_0, window_bounds = array<i64: 128, 128>}, {transform_indices = @transform_1, window_bounds = array<i64: 128, 128>}, {transform_indices = @transform_2, window_bounds = array<i64: 1, 128>}, {transform_indices = @transform_3, window_bounds = array<i64: 128, 128>}]} {
    %c0_i32 = arith.constant 0 : i32
    %0 = arith.cmpi eq, %arg2, %c0_i32 : i32
    %1 = arith.extui %0 : i1 to i32
    %c0_i32_0 = arith.constant 0 : i32
    %2 = arith.cmpi ne, %1, %c0_i32_0 : i32
    scf.if %2 {
      %cst_10 = arith.constant 0.000000e+00 : f32
      %14 = vector.broadcast %cst_10 : f32 to vector<128x128xf32>
      %c0_11 = arith.constant 0 : index
      %c0_12 = arith.constant 0 : index
      %15 = vector.load %arg7[%c0_11, %c0_12] : memref<128x128xf32, #tpu.memory_space<vmem>>, vector<128x128xf32>
      tpu.vector_store %arg7[%c0_11, %c0_12], %14 {strides = array<i32>} : memref<128x128xf32, #tpu.memory_space<vmem>>, vector<128x128xf32>,
    } else {
    }
    %c0 = arith.constant 0 : index
    %c0_1 = arith.constant 0 : index
    %3 = vector.load %arg7[%c0, %c0_1] : memref<128x128xf32, #tpu.memory_space<vmem>>, vector<128x128xf32>
    %c0_2 = arith.constant 0 : index
    %c0_3 = arith.constant 0 : index
    %4 = vector.load %arg3[%c0_2, %c0_3] : memref<128x128xf32, #tpu.memory_space<vmem>>, vector<128x128xf32>
    %5 = arith.truncf %4 : vector<128x128xf32> to vector<128x128xbf16>
    %c0_4 = arith.constant 0 : index
    %c0_5 = arith.constant 0 : index
    %6 = vector.load %arg4[%c0_4, %c0_5] : memref<128x128xf32, #tpu.memory_space<vmem>>, vector<128x128xf32>
    %7 = arith.truncf %6 : vector<128x128xf32> to vector<128x128xbf16>
    %cst = arith.constant dense<0.000000e+00> : vector<128x128xf32>
    %8 = tpu.matmul %5, %7, %cst {dimension_numbers = #tpu.dot_dimension_numbers<[1], [0], [0], [1], [0, 0, 1, 1], [], []>} : vector<128x128xbf16>, vector<128x128xbf16>, vector<128x128xf32> -> vector<128x128xf32>
    %9 = arith.addf %3, %8 : vector<128x128xf32>
    %c0_6 = arith.constant 0 : index
    %c0_7 = arith.constant 0 : index
    %10 = vector.load %arg7[%c0_6, %c0_7] : memref<128x128xf32, #tpu.memory_space<vmem>>, vector<128x128xf32>
    tpu.vector_store %arg7[%c0_6, %c0_7], %9 {strides = array<i32>} : memref<128x128xf32, #tpu.memory_space<vmem>>, vector<128x128xf32>,
    %c0_i32_8 = arith.constant 0 : i32
    %11 = arith.cmpi eq, %arg2, %c0_i32_8 : i32
    %12 = arith.extui %11 : i1 to i32
    %c0_i32_9 = arith.constant 0 : i32
    %13 = arith.cmpi ne, %12, %c0_i32_9 : i32
    scf.if %13 {
      %c0_10 = arith.constant 0 : index
      %c0_11 = arith.constant 0 : index
      %14 = vector.load %arg7[%c0_10, %c0_11] : memref<128x128xf32, #tpu.memory_space<vmem>>, vector<128x128xf32>
      %c0_12 = arith.constant 0 : index
      %c0_13 = arith.constant 0 : index
      %15 = vector.load %arg5[%c0_12, %c0_13] : memref<1x128xf32, #tpu.memory_space<vmem>>, vector<1x128xf32>
      %16 = vector.broadcast %15 : vector<1x128xf32> to vector<128x128xf32>
      %17 = arith.addf %14, %16 : vector<128x128xf32>
      %c0_14 = arith.constant 0 : index
      %c0_15 = arith.constant 0 : index
      %18 = vector.load %arg6[%c0_14, %c0_15] : memref<128x128xf32, #tpu.memory_space<vmem>>, vector<128x128xf32>
      tpu.vector_store %arg6[%c0_14, %c0_15], %17 {strides = array<i32>} : memref<128x128xf32, #tpu.memory_space<vmem>>, vector<128x128xf32>,
    } else {
    }
    return
  }
  func.func @transform_0(%arg0: i32, %arg1: i32, %arg2: i32) -> (i32, i32) {
    %c0_i32 = arith.constant 0 : i32
    return %arg0, %arg2 : i32, i32
  }
  func.func @transform_1(%arg0: i32, %arg1: i32, %arg2: i32) -> (i32, i32) {
    %c0_i32 = arith.constant 0 : i32
    return %arg2, %arg1 : i32, i32
  }
  func.func @transform_2(%arg0: i32, %arg1: i32, %arg2: i32) -> (i32, i32) {
    %c0_i32 = arith.constant 0 : i32
    %c0_i32_0 = arith.constant 0 : i32
    return %c0_i32, %arg1 : i32, i32
  }
  func.func @transform_3(%arg0: i32, %arg1: i32, %arg2: i32) -> (i32, i32) {
    %c0_i32 = arith.constant 0 : i32
    return %arg0, %arg1 : i32, i32
  }
}

</mosaic_0001>

<bundles_post_ra>
// kernel: tpu_custom_call.1
= control target key start
LH: loop header
LB: loop body
LE: loop exit
PB: predicated region body
PF: predicated region fallthrough
CT: control target
= control target key end

     0   :  { %8 = vsyncpa [#allocation4], 0  ;;  %s548_s0 = inlined_call_operand.hbm [shape: f32[128,128], index: 0, kind: input, shape index: {}]   ;;  %s549_s1 = inlined_call_operand.hbm [shape: f32[128,128], index: 1, kind: input, shape index: {}]   ;;  %s550_s2 = inlined_call_operand.vmem [shape: f32[1,128], index: 2, kind: input, shape index: {}]   ;;  %s551_s3 = inlined_call_operand.hbm [shape: f32[128,128], index: 3, kind: output, shape index: {}]  }
   0x1   :  { %9 = vsyncpa [#allocation7], 0 }
   0x2   :  { %10 = vsyncpa [#allocation5], 0  ;;  %s475_s12 = smov [#allocation3]   ;;  %s403_s16 = scalar_lea.hbm %s548_s0, 2048 }
   0x3   :  { %s16_s13 = sshll.u32 %s475_s12, 4  ;;  %p404_p0 = scmp.ne.s32.totalorder %s548_s0, %s403_s16  ;;  %s17_s13 = int_to_ptr.vmem [resolvable:$true] %s16_s13 }
   0x4   :  { %p407_p1 = scmp.lt.u32.totalorder %s403_s16, %s548_s0 }
   0x6   :  { %p409_p2 = pnand %p407_p1, %p404_p0 }
   0x8   :  { %412 = shalt.err (!%p409_p2)
}
   0x9   :  { %s413_s21 = scalar_lea.vmem %s17_s13, 2048  ;;  %p418_p4 = scmp.lt.s32.totalorder %s17_s13, %s17_s13 }
   0xa   :  { %p414_p3 = scmp.ne.s32.totalorder %s17_s13, %s413_s21  ;;  %p419_p5 = scmp.lt.s32.totalorder %s413_s21, %s413_s21 }
   0xc   :  { %p420_p6 = por %p419_p5, %p418_p4 }
   0xe   :  { %p421_p7 = pnand %p420_p6, %p414_p3 }
  0x10   :  { %424 = shalt.err (!%p421_p7)
}
  0x11   :  { %s476_s22 = smov 128   ;;  %s477_s23 = smov 8  }
  0x12   :  { %22 = dma.hbm_to_vmem [thread:$0]  %s548_s0, 2048, %s17_s13, [#allocation4], %s476_s22, %s476_s22, %s477_s23  }
  0x13   :  { %s478_s26 = smov [#allocation6]   ;;  %s425_s30 = scalar_lea.hbm %s549_s1, 2048 }
  0x14   :  { %s28_s27 = sshll.u32 %s478_s26, 4  ;;  %p426_p8 = scmp.ne.s32.totalorder %s549_s1, %s425_s30  ;;  %s29_s27 = int_to_ptr.vmem [resolvable:$true] %s28_s27 }
  0x15   :  { %p429_p9 = scmp.lt.u32.totalorder %s425_s30, %s549_s1 }
  0x17   :  { %p431_p10 = pnand %p429_p9, %p426_p8 }
  0x19   :  { %434 = shalt.err (!%p431_p10)
}
  0x1a   :  { %s435_s8 = scalar_lea.vmem %s29_s27, 2048  ;;  %p440_p12 = scmp.lt.s32.totalorder %s29_s27, %s29_s27 }
  0x1b   :  { %p436_p11 = scmp.ne.s32.totalorder %s29_s27, %s435_s8  ;;  %p441_p13 = scmp.lt.s32.totalorder %s435_s8, %s435_s8 }
  0x1d   :  { %p442_p0 = por %p441_p13, %p440_p12 }
  0x1f   :  { %p443_p1 = pnand %p442_p0, %p436_p11 }
  0x21   :  { %446 = shalt.err (!%p443_p1)
}
  0x22   :  { %34 = dma.hbm_to_vmem [thread:$0]  %s549_s1, 2048, %s29_s27, [#allocation7], %s476_s22, %s476_s22, %s477_s23  }
  0x23   :  { %469 = dma.done.wait [#allocation4], 2048  }
  0x24   :  { %470 = vsyncadd [#allocation4], 4294965248 }
  0x25   :  { %471 = dma.done.wait [#allocation7], 2048  }
  0x26   :  { %472 = vsyncadd [#allocation7], 4294965248  ;;  %v104_v0 = vld [vmem:[#allocation6] sm:$0xff]  ;;  %v105_v1 = vld [vmem:[#allocation6 + $0x8] sm:$0xff] }
  0x27   :  { %v106_v2 = vld [vmem:[#allocation6 + $0x10] sm:$0xff]  ;;  %v120_v3 = vpack.c.bf16 %v105_v1, %v104_v0  ;;  %v107_v4 = vld [vmem:[#allocation6 + $0x18] sm:$0xff]  ;;  %v108_v6 = vld [vmem:[#allocation6 + $0x20] sm:$0xff] }
  0x28   :  { %v121_v5 = vpack.c.bf16 %v107_v4, %v106_v2  ;;  %v109_v7 = vld [vmem:[#allocation6 + $0x28] sm:$0xff]  ;;  %v110_v9 = vld [vmem:[#allocation6 + $0x30] sm:$0xff]  ;;  %v80_v10 = vld [vmem:[#allocation3] sm:$0xff] }
  0x29   :  { %350 = vmatprep.subr.bf16.mxu0 %v120_v3  ;;  %382 = vmatprep.subr.bf16.mxu1 %v120_v3  ;;  %v122_v8 = vpack.c.bf16 %v109_v7, %v108_v6  ;;  %v81_v11 = vld [vmem:[#allocation3 + $0x8] sm:$0xff]  ;;  %v111_v12 = vld [vmem:[#allocation6 + $0x38] sm:$0xff]  ;;  %v88_v14 = vld [vmem:[#allocation3 + $0x40] sm:$0xff] }
  0x2a   :  { %351 = vmatpush3.bf16.msra.mxu0 %v120_v3  ;;  %390 = vmatpush3.bf16.msra.mxu1 %v120_v3  ;;  %v96_v13 = vpack.c.bf16 %v81_v11, %v80_v10  ;;  %v89_v15 = vld [vmem:[#allocation3 + $0x48] sm:$0xff]  ;;  %v123_v17 = vpack.c.bf16 %v111_v12, %v110_v9  ;;  %v112_v18 = vld [vmem:[#allocation6 + $0x40] sm:$0xff]  ;;  %v114_v21 = vld [vmem:[#allocation6 + $0x50] sm:$0xff] }
  0x2b   :  { %352 = vmatprep.subr.bf16.mxu0 %v121_v5  ;;  %383 = vmatprep.subr.bf16.mxu1 %v121_v5  ;;  %v100_v16 = vpack.c.bf16 %v89_v15, %v88_v14  ;;  %v113_v19 = vld [vmem:[#allocation6 + $0x48] sm:$0xff]  ;;  %v115_v22 = vld [vmem:[#allocation6 + $0x58] sm:$0xff]  ;;  %v116_v24 = vld [vmem:[#allocation6 + $0x60] sm:$0xff] }
  0x2c   :  { %366 = vmatprep.mubr.bf16.mxu0 %v96_v13  ;;  %v124_v20 = vpack.c.bf16 %v113_v19, %v112_v18  ;;  %v125_v23 = vpack.c.bf16 %v115_v22, %v114_v21  ;;  %v117_v25 = vld [vmem:[#allocation6 + $0x68] sm:$0xff]  ;;  %v118_v27 = vld [vmem:[#allocation6 + $0x70] sm:$0xff]  ;;  %v119_v28 = vld [vmem:[#allocation6 + $0x78] sm:$0xff] }
  0x2d   :  { %374 = vmatprep.mubr.bf16.mxu1 %v100_v16  ;;  %v126_v26 = vpack.c.bf16 %v117_v25, %v116_v24  ;;  %v127_v29 = vpack.c.bf16 %v119_v28, %v118_v27  ;;  %v82_v30 = vld [vmem:[#allocation3 + $0x10] sm:$0xff]  ;;  %v83_v31 = vld [vmem:[#allocation3 + $0x18] sm:$0xff]  ;;  %v84_v34 = vld [vmem:[#allocation3 + $0x20] sm:$0xff] }
  0x2e   :  { %353 = vmatpush3.bf16.msra.mxu0 %v121_v5  ;;  %391 = vmatpush3.bf16.msra.mxu1 %v121_v5  ;;  %v90_v32 = vld [vmem:[#allocation3 + $0x50] sm:$0xff]  ;;  %v91_v33 = vld [vmem:[#allocation3 + $0x58] sm:$0xff]  ;;  %v85_v35 = vld [vmem:[#allocation3 + $0x28] sm:$0xff]  ;;  %v97_v38 = vpack.c.bf16 %v83_v31, %v82_v30 }
  0x2f   :  { %354 = vmatprep.subr.bf16.mxu0 %v122_v8  ;;  %384 = vmatprep.subr.bf16.mxu1 %v122_v8  ;;  %v92_v36 = vld [vmem:[#allocation3 + $0x60] sm:$0xff]  ;;  %v93_v37 = vld [vmem:[#allocation3 + $0x68] sm:$0xff]  ;;  %v101_v39 = vpack.c.bf16 %v91_v33, %v90_v32  ;;  %v98_v40 = vpack.c.bf16 %v85_v35, %v84_v34  ;;  %v86_v42 = vld [vmem:[#allocation3 + $0x30] sm:$0xff] }
  0x30   :  { %v102_v41 = vpack.c.bf16 %v93_v37, %v92_v36  ;;  %v87_v43 = vld [vmem:[#allocation3 + $0x38] sm:$0xff]  ;;  %v94_v44 = vld [vmem:[#allocation3 + $0x70] sm:$0xff]  ;;  %v333_v48 = vld [vmem:[%s550_s2] ss:$0 sm:$0xff]  ;;  %s479_s2 = smov [#allocation8]  }
  0x31   :  { %v95_v45 = vld [vmem:[#allocation3 + $0x78] sm:$0xff]  ;;  %v99_v46 = vpack.c.bf16 %v87_v43, %v86_v42  ;;  %s320_s11 = sshll.u32 %s479_s2, 4  ;;  %s321_s11 = int_to_ptr.vmem [resolvable:$true] %s320_s11 }
  0x32   :  { %355 = vmatpush3.bf16.msra.mxu0 %v122_v8  ;;  %392 = vmatpush3.bf16.msra.mxu1 %v122_v8  ;;  %v103_v47 = vpack.c.bf16 %v95_v45, %v94_v44  ;;  %s447_s12 = scalar_lea.vmem %s321_s11, 2048  ;;  %p452_p3 = scmp.lt.s32.totalorder %s321_s11, %s321_s11 }
  0x33   :  { %356 = vmatprep.subr.bf16.mxu0 %v123_v17  ;;  %385 = vmatprep.subr.bf16.mxu1 %v123_v17  ;;  %p448_p2 = scmp.ne.s32.totalorder %s321_s11, %s447_s12  ;;  %p453_p4 = scmp.lt.s32.totalorder %s447_s12, %s447_s12 }
  0x35   :  { %p454_p5 = por %p453_p4, %p452_p3 }
  0x36   :  { %357 = vmatpush3.bf16.msra.mxu0 %v123_v17  ;;  %393 = vmatpush3.bf16.msra.mxu1 %v123_v17 }
  0x37   :  { %358 = vmatprep.subr.bf16.mxu0 %v124_v20  ;;  %386 = vmatprep.subr.bf16.mxu1 %v124_v20  ;;  %p455_p6 = pnand %p454_p5, %p448_p2 }
  0x3a   :  { %359 = vmatpush3.bf16.msra.mxu0 %v124_v20  ;;  %394 = vmatpush3.bf16.msra.mxu1 %v124_v20 }
  0x3b   :  { %360 = vmatprep.subr.bf16.mxu0 %v125_v23  ;;  %387 = vmatprep.subr.bf16.mxu1 %v125_v23 }
  0x3e   :  { %361 = vmatpush3.bf16.msra.mxu0 %v125_v23  ;;  %395 = vmatpush3.bf16.msra.mxu1 %v125_v23 }
  0x3f   :  { %362 = vmatprep.subr.bf16.mxu0 %v126_v26  ;;  %388 = vmatprep.subr.bf16.mxu1 %v126_v26 }
  0x42   :  { %363 = vmatpush3.bf16.msra.mxu0 %v126_v26  ;;  %396 = vmatpush3.bf16.msra.mxu1 %v126_v26 }
  0x43   :  { %364 = vmatprep.subr.bf16.mxu0 %v127_v29  ;;  %389 = vmatprep.subr.bf16.mxu1 %v127_v29 }
  0x46   :  { %365 = vmatpush3.bf16.msra.mxu0 %v127_v29  ;;  %397 = vmatpush3.bf16.msra.mxu1 %v127_v29 }
  0x49   :  { %367 = vmatmul.mubr.bf16.vlgmr.msra.gmra.mrb[0].mxu0 %v97_v38  ;;  %375 = vmatmul.mubr.bf16.vlgmr.msra.gmra.mrb[0].mxu1 %v101_v39 }
  0x4a   :  { %370 = vmatprep.mubr.bf16.mxu0 %v98_v40  ;;  %378 = vmatprep.mubr.bf16.mxu1 %v102_v41 }
  0x51   :  { %371 = vmatmul.mubr.bf16.gmra.mrb[4].mxu0 %v99_v46  ;;  %379 = vmatmul.mubr.bf16.gmra.mrb[4].mxu1 %v103_v47 }
 0x11c   :  { %v368_v49 = vpop.f32.mrb[0].mxu0  ;;  %v376_v50 = vpop.f32.mrb[0].mxu1 }
 0x11d   :  { %v285_v51 = vadd.f32 %v368_v49, %v333_v48  ;;  %v293_v52 = vadd.f32 %v376_v50, %v333_v48  ;;  %v162_v53 = vpop.f32.mrb[1].mxu0  ;;  %v194_v54 = vpop.f32.mrb[1].mxu1 }
 0x11e   :  { %v283_v55 = vadd.f32 %v333_v48, %v162_v53  ;;  %v291_v56 = vadd.f32 %v333_v48, %v194_v54  ;;  %v369_v57 = vpop.f32.mrb[2].mxu0  ;;  %v377_v58 = vpop.f32.mrb[2].mxu1 }
 0x11f   :  { %301 = vst [vmem:[#allocation8 + $0x10] sm:$0xff] %v285_v51  ;;  %309 = vst [vmem:[#allocation8 + $0x50] sm:$0xff] %v293_v52  ;;  %v286_v59 = vadd.f32 %v369_v57, %v333_v48  ;;  %v294_v60 = vadd.f32 %v377_v58, %v333_v48  ;;  %v165_v61 = vpop.f32.mrb[3].mxu0  ;;  %v197_v62 = vpop.f32.mrb[3].mxu1 }
 0x120   :  { %299 = vst [vmem:[#allocation8] sm:$0xff] %v283_v55  ;;  %307 = vst [vmem:[#allocation8 + $0x40] sm:$0xff] %v291_v56  ;;  %v284_v63 = vadd.f32 %v333_v48, %v165_v61  ;;  %v292_v0 = vadd.f32 %v333_v48, %v197_v62 }
 0x121   :  { %302 = vst [vmem:[#allocation8 + $0x18] sm:$0xff] %v286_v59  ;;  %310 = vst [vmem:[#allocation8 + $0x58] sm:$0xff] %v294_v60 }
 0x122   :  { %300 = vst [vmem:[#allocation8 + $0x8] sm:$0xff] %v284_v63  ;;  %308 = vst [vmem:[#allocation8 + $0x48] sm:$0xff] %v292_v0 }
 0x124   :  { %v372_v1 = vpop.f32.mrb[4].mxu0  ;;  %v380_v2 = vpop.f32.mrb[4].mxu1 }
 0x125   :  { %v289_v3 = vadd.f32 %v372_v1, %v333_v48  ;;  %v297_v4 = vadd.f32 %v380_v2, %v333_v48  ;;  %v178_v5 = vpop.f32.mrb[5].mxu0  ;;  %v210_v6 = vpop.f32.mrb[5].mxu1 }
 0x126   :  { %v287_v7 = vadd.f32 %v333_v48, %v178_v5  ;;  %v295_v8 = vadd.f32 %v333_v48, %v210_v6  ;;  %v373_v9 = vpop.f32.mrb[6].mxu0  ;;  %v381_v10 = vpop.f32.mrb[6].mxu1 }
 0x127   :  { %305 = vst [vmem:[#allocation8 + $0x30] sm:$0xff] %v289_v3  ;;  %313 = vst [vmem:[#allocation8 + $0x70] sm:$0xff] %v297_v4  ;;  %v290_v11 = vadd.f32 %v373_v9, %v333_v48  ;;  %v298_v12 = vadd.f32 %v381_v10, %v333_v48  ;;  %v181_v13 = vpop.f32.mrb[7].mxu0  ;;  %v213_v14 = vpop.f32.mrb[7].mxu1 }
 0x128   :  { %303 = vst [vmem:[#allocation8 + $0x20] sm:$0xff] %v287_v7  ;;  %311 = vst [vmem:[#allocation8 + $0x60] sm:$0xff] %v295_v8  ;;  %v288_v15 = vadd.f32 %v333_v48, %v181_v13  ;;  %v296_v16 = vadd.f32 %v333_v48, %v213_v14 }
 0x129   :  { %306 = vst [vmem:[#allocation8 + $0x38] sm:$0xff] %v290_v11  ;;  %314 = vst [vmem:[#allocation8 + $0x78] sm:$0xff] %v298_v12 }
 0x12a   :  { %304 = vst [vmem:[#allocation8 + $0x28] sm:$0xff] %v288_v15  ;;  %312 = vst [vmem:[#allocation8 + $0x68] sm:$0xff] %v296_v16 }
 0x12b   :  { %458 = shalt.err (!%p455_p6)
}
 0x12c   :  { %s459_s15 = scalar_lea.hbm %s551_s3, 2048 }
 0x12d   :  { %p460_p7 = scmp.ne.s32.totalorder %s551_s3, %s459_s15  ;;  %p463_p8 = scmp.lt.u32.totalorder %s459_s15, %s551_s3 }
 0x12f   :  { %p465_p9 = pnand %p463_p8, %p460_p7 }
 0x131   :  { %468 = shalt.err (!%p465_p9)
}
 0x132   :  { %326 = dma.vmem_to_hbm [thread:$0]  %s321_s11, 2048, %s551_s3, [#allocation5], %s476_s22, %s476_s22, %s477_s23  }
 0x133   :  { %473 = dma.done.wait [#allocation5], 2048  }
 0x134   :  { %474 = vsyncadd [#allocation5], 4294965248 }
 0x135   :  { %330 = vsyncpa [#allocation4], 1 }
 0x136   :  { %331 = vsyncpa [#allocation7], 1 }
 0x137   :  { %332 = vsyncpa [#allocation5], 1 }

</bundles_post_ra>
